<compile_context>
chip_gen: v5e
topology: v5e:2x2
jax: 0.10.0
libtpu: 0.0.40
codegen_flags: <defaults>
</compile_context>

<pallas_src>
import functools

import jax
import jax.numpy as jnp
from jax import lax
from jax.experimental import pallas as pl
from jax.experimental.pallas import tpu as pltpu

EPS = 1e-5
NEG_SLOPE = 0.2


def _shift_right(y, zero_col):
    """y_prev[:, c] = y[:, c-1]; column 0 = 0 (implicit conv zero padding)."""
    return jnp.concatenate([zero_col, y[:, :-1]], axis=1)


def _shift_left(y, zero_col):
    """y_next[:, c] = y[:, c+1]; last column = 0 (implicit conv zero padding)."""
    return jnp.concatenate([y[:, 1:], zero_col], axis=1)


def _conv1d_nobias(y, w_ref, zero_col, valid, mm_dtype, fused):
    """Conv1d (k=3, pad=1, bias dropped) on a (C_pad, L_pad) slab.

    w_ref: (C_pad, 3*C_pad) = [W_{l-1} | W_l | W_{l+1}] along the lane axis.
    `y` must already be zero in all columns >= L. `valid` (col < L broadcast
    mask, or None when L == L_pad) re-zeroes column L of the right-shifted
    operand so the conv output is exactly zero in every padded column.
    """
    y = y.astype(mm_dtype)                   # cast once; shifts done in mm_dtype
    y_prev = _shift_right(y, zero_col)
    if valid is not None:
        y_prev = jnp.where(valid, y_prev, 0)
    y_next = _shift_left(y, zero_col)
    C_pad = y.shape[0]
    if fused:
        # Small C: one MXU pass with a 3*C_pad contraction dim.
        y3 = jnp.concatenate([y_prev, y, y_next], axis=0)
        return jnp.dot(w_ref[...], y3, preferred_element_type=jnp.float32)
    # Large C: three accumulating dots, no stacked RHS materialized.
    w = w_ref[...]
    out = jnp.dot(w[:, :C_pad], y_prev, preferred_element_type=jnp.float32)
    out = out + jnp.dot(w[:, C_pad:2 * C_pad], y, preferred_element_type=jnp.float32)
    out = out + jnp.dot(w[:, 2 * C_pad:], y_next, preferred_element_type=jnp.float32)
    return out


def _instance_norm(y, L):
    """InstanceNorm1d (no affine, biased var, eps=1e-5). `y` is exactly zero in
    padded columns, so unmasked sums over L_pad columns equal sums over L."""
    inv_n = jnp.float32(1.0 / L)
    s = jnp.sum(y, axis=1, keepdims=True)
    ss = jnp.sum(y * y, axis=1, keepdims=True)
    mean = s * inv_n
    var = jnp.maximum(ss * inv_n - mean * mean, 0.0)
    return (y - mean) * lax.rsqrt(var + EPS)


def _conv_residual_block_kernel(x_ref, w1_ref, w2_ref, o_ref, *, L, mm_dtype, fused):
    C_pad, L_pad = x_ref.shape
    # Masks / constants hoisted: built once per grid step.
    if L < L_pad:
        col = lax.broadcasted_iota(jnp.int32, (1, L_pad), 1)
        valid = col < L
    else:
        valid = None
    zero_col = jnp.zeros((C_pad, 1), mm_dtype)

    x = x_ref[...].astype(jnp.float32)                    # (C_pad, L_pad), zero-padded

    h = _conv1d_nobias(x, w1_ref, zero_col, valid, mm_dtype, fused)  # conv1 (bias cancels)
    h = _instance_norm(h, L)                                         # norm1
    h = jnp.where(h > 0, h, NEG_SLOPE * h)                           # LeakyReLU(0.2)
    # dropout: identity in eval mode
    if valid is not None:
        h = jnp.where(valid, h, 0.0)       # zero padded cols once -> clean conv2 input
    h = _conv1d_nobias(h, w2_ref, zero_col, valid, mm_dtype, fused)  # conv2 (bias cancels)
    h = _instance_norm(h, L)                                         # norm2
    o_ref[...] = (h + x).astype(o_ref.dtype)                         # residual
    # dropout: identity in eval mode


def _round_up(v, m):
    return (v + m - 1) // m * m


def _vmem_ceiling_bytes():
    try:
        return int(pltpu.get_tpu_info().vmem_capacity_bytes * 0.85)
    except Exception:
        return 64 * 2**20   # conservative fallback (fits every generation)


def conv_residual_block(x, w1, b1, w2, b2, *, use_bf16_matmul=True):
    """x: (N, C, L) float32. Weights: (C, C, 3) PyTorch Conv1d layout.

    Biases are accepted for API parity but unused: a per-channel bias before
    InstanceNorm1d(affine=False) cancels exactly in the normalized output.
    """
    del b1, b2
    N, C, L = x.shape
    mm_dtype = jnp.bfloat16 if use_bf16_matmul else jnp.float32
    c_mult = 16 if use_bf16_matmul else 8      # bf16 packs 2 rows per sublane
    C_pad = _round_up(max(C, c_mult), c_mult)
    L_pad = _round_up(max(L, 128), 128)        # lane-dense blocks and stores
    fused = C_pad < 128                        # fused 3C dot only for small C

    # Host-side (free) padding + fused weight re-layout (C_out, 3*C_in).
    x_p = jnp.pad(x, ((0, 0), (0, C_pad - C), (0, L_pad - L)))

    def fuse_w(w):
        wp = jnp.pad(w, ((0, C_pad - C), (0, C_pad - C), (0, 0)))
        return jnp.concatenate([wp[:, :, 0], wp[:, :, 1], wp[:, :, 2]],
                               axis=1).astype(mm_dtype)

    w1_f, w2_f = fuse_w(w1), fuse_w(w2)

    # Generation-aware VMEM budget: double-buffered in/out blocks + weights +
    # counted live slab temporaries (~6 f32 + ~4 mm_dtype slabs).
    itemsize_mm = jnp.dtype(mm_dtype).itemsize
    slab_f32 = C_pad * L_pad * 4
    slab_mm = C_pad * L_pad * itemsize_mm
    weight_bytes = 2 * C_pad * 3 * C_pad * itemsize_mm
    budget = 4 * slab_f32 + 2 * weight_bytes + 6 * slab_f32 + 4 * slab_mm
    vmem_limit = min(_vmem_ceiling_bytes(), max(32 * 2**20, budget))

    kernel = functools.partial(_conv_residual_block_kernel,
                               L=L, mm_dtype=mm_dtype, fused=fused)
    out = pl.pallas_call(
        kernel,
        out_shape=jax.ShapeDtypeStruct((N, C_pad, L_pad), x.dtype),
        grid=(N,),
        in_specs=[
            pl.BlockSpec((None, C_pad, L_pad), lambda n: (n, 0, 0)),
            pl.BlockSpec((C_pad, 3 * C_pad), lambda n: (0, 0)),   # constant index:
            pl.BlockSpec((C_pad, 3 * C_pad), lambda n: (0, 0)),   #  fetched once
        ],
        out_specs=pl.BlockSpec((None, C_pad, L_pad), lambda n: (n, 0, 0)),
        compiler_params=pltpu.CompilerParams(
            dimension_semantics=("parallel",),
            vmem_limit_bytes=vmem_limit,
        ),
    )(x_p, w1_f, w2_f)

    return out[:, :C, :L]


def _reference(x, w1, b1, w2, b2):
    """Pure-JAX f32 reference mirroring the PyTorch forward (eval mode),
    including the conv biases (which must cancel under InstanceNorm)."""
    def conv(inp, w, b):
        out = lax.conv_general_dilated(
            inp, w, window_strides=(1,), padding=((1, 1),),
            dimension_numbers=("NCH", "OIH", "NCH"),
        )
        return out + b[None, :, None]

    def inorm(y):
        mean = jnp.mean(y, axis=2, keepdims=True)
        var = jnp.mean((y - mean) ** 2, axis=2, keepdims=True)
        return (y - mean) / jnp.sqrt(var + EPS)

    out = conv(x, w1, b1)
    out = inorm(out)
    out = jnp.where(out > 0, out, NEG_SLOPE * out)
    out = conv(out, w2, b2)
    out = inorm(out)
    return out + x


if __name__ == "__main__":
    key = jax.random.PRNGKey(0)
    N, C, L = 2, 4, 16

    kx, kw1, kb1, kw2, kb2 = jax.random.split(key, 5)
    x = jax.random.normal(kx, (N, C, L), dtype=jnp.float32)
    # Deterministic parameter init (PyTorch shapes: (C, C, 3) weights, (C,) biases).
    w1 = 0.1 * jax.random.normal(kw1, (C, C, 3), dtype=jnp.float32)
    b1 = 0.1 * jax.random.normal(kb1, (C,), dtype=jnp.float32)
    w2 = 0.1 * jax.random.normal(kw2, (C, C, 3), dtype=jnp.float32)
    b2 = 0.1 * jax.random.normal(kb2, (C,), dtype=jnp.float32)

    ref = _reference(x, w1, b1, w2, b2)

    # f32-matmul path: tight-tolerance semantics check (bias cancellation is exact math).
    out_f32 = conv_residual_block(x, w1, b1, w2, b2, use_bf16_matmul=False)
    jax.block_until_ready(out_f32)
    assert out_f32.shape == (N, C, L)
    assert jnp.allclose(out_f32, ref, atol=1e-3, rtol=1e-3), "f32 path mismatch vs reference"

    # Default (bf16 MXU operands, f32 accumulation + f32 norm math): loose tolerance.
    out_bf16 = conv_residual_block(x, w1, b1, w2, b2)
    jax.block_until_ready(out_bf16)
    assert out_bf16.shape == (N, C, L)
    assert jnp.allclose(out_bf16, ref, atol=1e-1, rtol=1e-1), "bf16 path mismatch vs reference"

    print("KERNEL_OK")
</pallas_src>

<mosaic_0001>
module attributes {stable_mosaic.version = 11 : i64} {
  func.func @_conv_residual_block_kernel(%arg0: i32, %arg1: memref<1x8x128xf32, #tpu.memory_space<vmem>>, %arg2: memref<8x24xf32, #tpu.memory_space<vmem>>, %arg3: memref<8x24xf32, #tpu.memory_space<vmem>>, %arg4: memref<1x8x128xf32, #tpu.memory_space<vmem>>) attributes {dimension_semantics = [#tpu.dimension_semantics<parallel>], iteration_bounds = array<i64: 2>, scalar_prefetch = 0 : i64, scratch_operands = 0 : i64, tpu.core_type = #tpu.core_type<tc>, window_params = [{transform_indices = @transform_0, window_bounds = array<i64: 1, 8, 128>}, {pipeline_mode = #tpu.pipeline_mode<synchronous>, transform_indices = @transform_1, window_bounds = array<i64: 8, 24>}, {pipeline_mode = #tpu.pipeline_mode<synchronous>, transform_indices = @transform_2, window_bounds = array<i64: 8, 24>}, {transform_indices = @transform_3, window_bounds = array<i64: 1, 8, 128>}]} {
    %0 = tpu.iota {dimensions = array<i32: 1>} : vector<1x128xi32>
    %c16_i32 = arith.constant 16 : i32
    %1 = vector.broadcast %c16_i32 : i32 to vector<1x128xi32>
    %2 = arith.cmpi slt, %0, %1 : vector<1x128xi32>
    %cst = arith.constant 0.000000e+00 : f32
    %3 = vector.broadcast %cst : f32 to vector<8x1xf32>
    %c0 = arith.constant 0 : index
    %c0_0 = arith.constant 0 : index
    %c0_1 = arith.constant 0 : index
    %4 = vector.load %arg1[%c0, %c0_0, %c0_1] : memref<1x8x128xf32, #tpu.memory_space<vmem>>, vector<1x8x128xf32>
    %5 = vector.shape_cast %4 : vector<1x8x128xf32> to vector<8x128xf32>
    %6 = vector.extract_strided_slice %5 {offsets = [0, 0], sizes = [8, 127], strides = [1, 1]} : vector<8x128xf32> to vector<8x127xf32>
    %7 = tpu.concatenate %3, %6 in 1 : vector<8x1xf32>, vector<8x127xf32> -> vector<8x128xf32>
    %c0_i32 = arith.constant 0 : i32
    %8 = arith.sitofp %c0_i32 : i32 to f32
    %9 = vector.shape_cast %2 : vector<1x128xi1> to vector<1x128xi1>
    %10 = vector.broadcast %9 : vector<1x128xi1> to vector<8x128xi1>
    %11 = vector.broadcast %8 : f32 to vector<8x128xf32>
    %12 = arith.select %10, %7, %11 : vector<8x128xi1>, vector<8x128xf32>
    %13 = vector.extract_strided_slice %5 {offsets = [0, 1], sizes = [8, 127], strides = [1, 1]} : vector<8x128xf32> to vector<8x127xf32>
    %14 = tpu.concatenate %13, %3 in 1 : vector<8x127xf32>, vector<8x1xf32> -> vector<8x128xf32>
    %15 = tpu.concatenate %12, %5, %14 in 0 : vector<8x128xf32>, vector<8x128xf32>, vector<8x128xf32> -> vector<24x128xf32>
    %c0_2 = arith.constant 0 : index
    %c0_3 = arith.constant 0 : index
    %16 = vector.load %arg2[%c0_2, %c0_3] : memref<8x24xf32, #tpu.memory_space<vmem>>, vector<8x24xf32>
    %cst_4 = arith.constant dense<0.000000e+00> : vector<8x128xf32>
    %17 = tpu.matmul %16, %15, %cst_4 {dimension_numbers = #tpu.dot_dimension_numbers<[1], [0], [0], [1], [0, 0, 1, 1], [], []>} : vector<8x24xf32>, vector<24x128xf32>, vector<8x128xf32> -> vector<8x128xf32>
    %cst_5 = arith.constant dense<0.000000e+00> : vector<8xf32>
    %18 = vector.multi_reduction <add>, %17, %cst_5 [1] : vector<8x128xf32> to vector<8xf32>
    %19 = vector.shape_cast %18 : vector<8xf32> to vector<8x1xf32>
    %20 = arith.mulf %17, %17 : vector<8x128xf32>
    %cst_6 = arith.constant dense<0.000000e+00> : vector<8xf32>
    %21 = vector.multi_reduction <add>, %20, %cst_6 [1] : vector<8x128xf32> to vector<8xf32>
    %22 = vector.shape_cast %21 : vector<8xf32> to vector<8x1xf32>
    %cst_7 = arith.constant 6.250000e-02 : f32
    %23 = vector.broadcast %cst_7 : f32 to vector<8x1xf32>
    %24 = arith.mulf %19, %23 : vector<8x1xf32>
    %cst_8 = arith.constant 6.250000e-02 : f32
    %25 = vector.broadcast %cst_8 : f32 to vector<8x1xf32>
    %26 = arith.mulf %22, %25 : vector<8x1xf32>
    %27 = arith.mulf %24, %24 : vector<8x1xf32>
    %28 = arith.subf %26, %27 : vector<8x1xf32>
    %cst_9 = arith.constant 0.000000e+00 : f32
    %29 = vector.broadcast %cst_9 : f32 to vector<8x1xf32>
    %30 = arith.maximumf %28, %29 : vector<8x1xf32>
    %31 = vector.broadcast %24 : vector<8x1xf32> to vector<8x128xf32>
    %32 = arith.subf %17, %31 : vector<8x128xf32>
    %cst_10 = arith.constant 9.99999974E-6 : f32
    %33 = vector.broadcast %cst_10 : f32 to vector<8x1xf32>
    %34 = arith.addf %30, %33 : vector<8x1xf32>
    %35 = math.rsqrt %34 : vector<8x1xf32>
    %36 = vector.broadcast %35 : vector<8x1xf32> to vector<8x128xf32>
    %37 = arith.mulf %32, %36 : vector<8x128xf32>
    %cst_11 = arith.constant 0.000000e+00 : f32
    %38 = vector.broadcast %cst_11 : f32 to vector<8x128xf32>
    %39 = arith.cmpf ogt, %37, %38 : vector<8x128xf32>
    %cst_12 = arith.constant 2.000000e-01 : f32
    %40 = vector.broadcast %cst_12 : f32 to vector<8x128xf32>
    %41 = arith.mulf %40, %37 : vector<8x128xf32>
    %42 = arith.select %39, %37, %41 : vector<8x128xi1>, vector<8x128xf32>
    %cst_13 = arith.constant 0.000000e+00 : f32
    %43 = vector.shape_cast %2 : vector<1x128xi1> to vector<1x128xi1>
    %44 = vector.broadcast %43 : vector<1x128xi1> to vector<8x128xi1>
    %45 = vector.broadcast %cst_13 : f32 to vector<8x128xf32>
    %46 = arith.select %44, %42, %45 : vector<8x128xi1>, vector<8x128xf32>
    %47 = vector.extract_strided_slice %46 {offsets = [0, 0], sizes = [8, 127], strides = [1, 1]} : vector<8x128xf32> to vector<8x127xf32>
    %48 = tpu.concatenate %3, %47 in 1 : vector<8x1xf32>, vector<8x127xf32> -> vector<8x128xf32>
    %c0_i32_14 = arith.constant 0 : i32
    %49 = arith.sitofp %c0_i32_14 : i32 to f32
    %50 = vector.shape_cast %2 : vector<1x128xi1> to vector<1x128xi1>
    %51 = vector.broadcast %50 : vector<1x128xi1> to vector<8x128xi1>
    %52 = vector.broadcast %49 : f32 to vector<8x128xf32>
    %53 = arith.select %51, %48, %52 : vector<8x128xi1>, vector<8x128xf32>
    %54 = vector.extract_strided_slice %46 {offsets = [0, 1], sizes = [8, 127], strides = [1, 1]} : vector<8x128xf32> to vector<8x127xf32>
    %55 = tpu.concatenate %54, %3 in 1 : vector<8x127xf32>, vector<8x1xf32> -> vector<8x128xf32>
    %56 = tpu.concatenate %53, %46, %55 in 0 : vector<8x128xf32>, vector<8x128xf32>, vector<8x128xf32> -> vector<24x128xf32>
    %c0_15 = arith.constant 0 : index
    %c0_16 = arith.constant 0 : index
    %57 = vector.load %arg3[%c0_15, %c0_16] : memref<8x24xf32, #tpu.memory_space<vmem>>, vector<8x24xf32>
    %cst_17 = arith.constant dense<0.000000e+00> : vector<8x128xf32>
    %58 = tpu.matmul %57, %56, %cst_17 {dimension_numbers = #tpu.dot_dimension_numbers<[1], [0], [0], [1], [0, 0, 1, 1], [], []>} : vector<8x24xf32>, vector<24x128xf32>, vector<8x128xf32> -> vector<8x128xf32>
    %cst_18 = arith.constant dense<0.000000e+00> : vector<8xf32>
    %59 = vector.multi_reduction <add>, %58, %cst_18 [1] : vector<8x128xf32> to vector<8xf32>
    %60 = vector.shape_cast %59 : vector<8xf32> to vector<8x1xf32>
    %61 = arith.mulf %58, %58 : vector<8x128xf32>
    %cst_19 = arith.constant dense<0.000000e+00> : vector<8xf32>
    %62 = vector.multi_reduction <add>, %61, %cst_19 [1] : vector<8x128xf32> to vector<8xf32>
    %63 = vector.shape_cast %62 : vector<8xf32> to vector<8x1xf32>
    %cst_20 = arith.constant 6.250000e-02 : f32
    %64 = vector.broadcast %cst_20 : f32 to vector<8x1xf32>
    %65 = arith.mulf %60, %64 : vector<8x1xf32>
    %cst_21 = arith.constant 6.250000e-02 : f32
    %66 = vector.broadcast %cst_21 : f32 to vector<8x1xf32>
    %67 = arith.mulf %63, %66 : vector<8x1xf32>
    %68 = arith.mulf %65, %65 : vector<8x1xf32>
    %69 = arith.subf %67, %68 : vector<8x1xf32>
    %cst_22 = arith.constant 0.000000e+00 : f32
    %70 = vector.broadcast %cst_22 : f32 to vector<8x1xf32>
    %71 = arith.maximumf %69, %70 : vector<8x1xf32>
    %72 = vector.broadcast %65 : vector<8x1xf32> to vector<8x128xf32>
    %73 = arith.subf %58, %72 : vector<8x128xf32>
    %cst_23 = arith.constant 9.99999974E-6 : f32
    %74 = vector.broadcast %cst_23 : f32 to vector<8x1xf32>
    %75 = arith.addf %71, %74 : vector<8x1xf32>
    %76 = math.rsqrt %75 : vector<8x1xf32>
    %77 = vector.broadcast %76 : vector<8x1xf32> to vector<8x128xf32>
    %78 = arith.mulf %73, %77 : vector<8x128xf32>
    %79 = arith.addf %78, %5 : vector<8x128xf32>
    %c0_24 = arith.constant 0 : index
    %c0_25 = arith.constant 0 : index
    %c0_26 = arith.constant 0 : index
    %80 = vector.load %arg4[%c0_24, %c0_25, %c0_26] : memref<1x8x128xf32, #tpu.memory_space<vmem>>, vector<1x8x128xf32>
    %81 = vector.shape_cast %80 : vector<1x8x128xf32> to vector<8x128xf32>
    %82 = vector.shape_cast %79 : vector<8x128xf32> to vector<1x8x128xf32>
    tpu.vector_store %arg4[%c0_24, %c0_25, %c0_26], %82 {strides = array<i32>} : memref<1x8x128xf32, #tpu.memory_space<vmem>>, vector<1x8x128xf32>,
    return
  }
  func.func @transform_0(%arg0: i32) -> (i32, i32, i32) {
    %c0_i32 = arith.constant 0 : i32
    %c0_i32_0 = arith.constant 0 : i32
    %c0_i32_1 = arith.constant 0 : i32
    return %arg0, %c0_i32, %c0_i32_0 : i32, i32, i32
  }
  func.func @transform_1(%arg0: i32) -> (i32, i32) {
    %c0_i32 = arith.constant 0 : i32
    %c0_i32_0 = arith.constant 0 : i32
    %c0_i32_1 = arith.constant 0 : i32
    return %c0_i32, %c0_i32_0 : i32, i32
  }
  func.func @transform_2(%arg0: i32) -> (i32, i32) {
    %c0_i32 = arith.constant 0 : i32
    %c0_i32_0 = arith.constant 0 : i32
    %c0_i32_1 = arith.constant 0 : i32
    return %c0_i32, %c0_i32_0 : i32, i32
  }
  func.func @transform_3(%arg0: i32) -> (i32, i32, i32) {
    %c0_i32 = arith.constant 0 : i32
    %c0_i32_0 = arith.constant 0 : i32
    %c0_i32_1 = arith.constant 0 : i32
    return %arg0, %c0_i32, %c0_i32_0 : i32, i32, i32
  }
}

</mosaic_0001>

<bundles_post_ra>
// kernel: tpu_custom_call.1
= control target key start
LH: loop header
LB: loop body
LE: loop exit
PB: predicated region body
PF: predicated region fallthrough
CT: control target
= control target key end

     0   :  { %8 = vsyncpa [#allocation3], 0  ;;  %s898_s0 = inlined_call_operand.hbm [shape: f32[2,8,128], index: 0, kind: input, shape index: {}]   ;;  %s899_s1 = inlined_call_operand.hbm [shape: f32[8,24], index: 1, kind: input, shape index: {}]   ;;  %s900_s2 = inlined_call_operand.hbm [shape: f32[8,24], index: 2, kind: input, shape index: {}]   ;;  %s901_s3 = inlined_call_operand.hbm [shape: f32[2,8,128], index: 3, kind: output, shape index: {}]  }
   0x1   :  { %10 = vsyncpa [#allocation3 + $0x1], 0 }
   0x2   :  { %11 = vsyncpa [#allocation6], 0 }
   0x3   :  { %12 = vsyncpa [#allocation4], 0 }
   0x4   :  { %14 = vsyncpa [#allocation4 + $0x1], 0  ;;  %s733_s12 = smov 0   ;;  %s735_s13 = smov 0  }
   0x5   :  { %s737_s14 = smov 0   ;;  %s739_s15 = smov 0  }
   0x6 LB: > { %s754_s16 = sadd.s32 4294967295, %s707_s15   ;;  %s451_s17 = sadd.s32 4294967294, %s707_s15   ;;  %s707_s15 = sphi %s739_s15, %s911_s15   ;;  %s703_s14 = sphi %s737_s14, %s910_s14   ;;  %s699_s13 = sphi %s735_s13, %s909_s13   ;;  %s695_s12 = sphi %s733_s12, %s908_s12  }
   0x7   : > { %p40_p0 = scmp.ne.s32.totalorder %s699_s13, %s695_s12  ;;  %p41_p1 = scmp.eq.s32.totalorder %s754_s16, 0 }
   0x8   : > { %p106_p2 = scmp.eq.s32.totalorder %s754_s16, 1  ;;  %p112_p3 = scmp.eq.s32.totalorder %s451_s17, 1 }
   0x9   : > { %p763_p4 = por %p41_p1, %p40_p0  ;;  %p452_p5 = scmp.ge.s32.totalorder %s707_s15, 1 }
   0xa   : > { %p768_p6 = por %p112_p3, %p40_p0  ;;  %p119_p7 = scmp.lt.s32.totalorder %s707_s15, 3 }
   0xb   : > { %s131_s22 = sshll.u32 %s899_s1, 4  ;;  %s709_s24 = smov [#allocation5]   ;;  %s132_s22 = int_to_ptr.hbm [resolvable:$true] %s131_s22 }
   0xc   : > { %p776_p8 = pnand %p452_p5, %p119_p7  ;;  %s133_s25 = sshll.u32 %s709_s24, 4  ;;  %s134_s25 = int_to_ptr.vmem [resolvable:$true] %s133_s25 }
   0xd   : > { %s143_s28 = sshll.u32 %s900_s2, 4  ;;  %s710_s29 = smov [#allocation7]   ;;  %s144_s28 = int_to_ptr.hbm [resolvable:$true] %s143_s28 }
   0xe   : > { %p486_p10 = pneg %p776_p8  ;;  %s145_s30 = sshll.u32 %s710_s29, 4  ;;  %s146_s30 = int_to_ptr.vmem [resolvable:$true] %s145_s30 }
   0xf   : > { %s789_s4 = sadd.s32 1, %s707_s15   ;;  %s27_s5 = sadd.s32 1, %s703_s14 }
  0x10   : > { %p487_p11 = pnand %p486_p10, %p41_p1  ;;  %s24_s6 = ssub.s32 %s707_s15, %s789_s4 }
  0x11   : > { %p34_p12 = scmp.ne.s32.totalorder %s703_s14, %s699_s13  ;;  %p25_p13 = scmp.eq.s32.totalorder %s24_s6, 0 }
  0x12   : > { %489 = dma.hbm_to_vmem [thread:$0]  (!%p487_p11), %s132_s22, 128, %s134_s25, [#allocation6]  }
  0x13   : > { %492 = dma.hbm_to_vmem [thread:$0]  (!%p487_p11), %s144_s28, 128, %s146_s30, [#allocation6]  }
  0x14   : > { %p35_p0 = scmp.eq.s32.totalorder %s707_s15, 0  ;;  %p799_p3 = por %p106_p2, %p34_p12 }
  0x15   : > { %p503_p5 = scmp.lt.s32.totalorder %s707_s15, 2  ;;  %s156_s9 = sand.u32 1, %s703_s14  }
  0x16   : > { %s805_s8 = scalar_select %p25_p13, %s703_s14, %s27_s5  }
  0x17   : > { %p36_p7 = por %p35_p0, %p34_p12  ;;  %s456_s10 = sshll.u32 %s156_s9, 3 }
  0x18   : > { %s457_s11 = sshll.u32 %s707_s15, 3  ;;  %s160_s22 = scalar_lea.vmem [#allocation2], %s456_s10 }
  0x19   : > { %s164_s21 = scalar_lea.hbm %s898_s0, %s457_s11  ;;  %s168_s24 = sshll.u32 %s160_s22, 4  ;;  %s169_s24 = int_to_ptr.vmem [resolvable:$true] %s168_s24 }
  0x1a   : > { %s166_s25 = sshll.u32 %s164_s21, 4  ;;  %p812_p2 = pnand %p503_p5, %p36_p7  ;;  %s167_s25 = int_to_ptr.hbm [resolvable:$true] %s166_s25 }
  0x1b   : > { %s157_s27 = scalar_lea.sflag [#allocation3], %s156_s9  ;;  %s607_s28 = sshra.s32 %s167_s25, 4  ;;  %s608_s28 = int_to_ptr.hbm [resolvable:$true] %s607_s28 }
  0x1c   : > { %s609_s29 = scalar_lea.hbm %s608_s28, 8  ;;  %p611_p11 = pneg %p812_p2 }
  0x1d   : > { %p610_p10 = scmp.ne.s32.totalorder %s608_s28, %s609_s29  ;;  %s614_s6 = scalar_lea.hbm %s898_s0, 16 }
  0x1e   : > { %p615_p0 = scmp.lt.s32.totalorder %s608_s28, %s898_s0  ;;  %p616_p5 = scmp.lt.s32.totalorder %s614_s6, %s609_s29 }
  0x1f   : > { %p612_p12 = pnand %p611_p11, %p610_p10 }
  0x20   : > { %p617_p7 = por %p616_p5, %p615_p0 }
  0x21   : > { %p613_p13 = pneg %p612_p12 }
  0x23   : > { %p618_p9 = pnand %p617_p7, %p613_p13 }
  0x25   : > { %621 = shalt.err (!%p618_p9)
}
  0x26   : > { %496 = dma.hbm_to_vmem [thread:$0]  (!%p812_p2), %s167_s25, 128, %s169_s24, %s157_s27  }
  0x27   : > { %177 = sbr.rel (%p776_p8) target bundleno = 833 (0x341), region = 32  ;;  %s829_s9 = sand.u32 (!%p776_p8), 1, %s699_s13  }
  0x28   : > { %s459_s17 = sshll.u32 (!%p776_p8), %s829_s9, 3  ;;  %s180_s20 = scalar_lea.sflag (!%p776_p8), [#allocation3], %s829_s9 }
  0x29   : > { %s183_s21 = scalar_lea.vmem (!%p776_p8), [#allocation2], %s459_s17 }
  0x2c   : > { %682 = dma.done.wait (%p763_p4), %s180_s20, 128  }
  0x2d   : > { %684 = vsyncadd (%p763_p4), %s180_s20, 4294967168 }
  0x2e   : > { %686 = dma.done.wait (%p41_p1), [#allocation6], 256  }
  0x2f   : > { %688 = vsyncadd (%p41_p1), [#allocation6], 4294967040  ;;  %v843_v0 = vld [vmem:[%s183_s21] sm:$0xff]  ;;  %s711_s23 = smov 127   ;;  %s712_s22 = smov 1   ;;  %vm233_vm0 = vcmask 1039360   ;;  %v217_v1 = vlaneseq }
  0x30   : > { %230 = vrot.lane.b32.xlu0 %v843_v0, %s711_s23  ;;  %vm225_vm1 = vcmask 7168   ;;  %v235_v5 = vld [vmem:[#allocation5] sm:$0xff]  ;;  %vm236_vm3 = vcmask 195584   ;;  %v297_v31 = vld [vmem:[#allocation7] sm:$0xff]  ;;  %s471_s18 = sshll.u32 %s754_s16, 3  ;;  %s216_s27 = scalar_lea.vmem [#allocation8], %s459_s17 }
  0x31   : > { %v218_v3 = vand.u32 127, %v217_v1  ;;  %s357_s26 = scalar_lea.hbm %s901_s3, %s471_s18  ;;  %s359_s28 = sshll.u32 %s216_s27, 4  ;;  %s360_s28 = int_to_ptr.vmem [resolvable:$true] %s359_s28 }
  0x32   : > { %s361_s29 = sshll.u32 %s357_s26, 4  ;;  %s347_s16 = scalar_lea.sflag [#allocation4], %s829_s9  ;;  %s362_s29 = int_to_ptr.hbm [resolvable:$true] %s361_s29 }
  0x33   : > { %vm219_vm2 = vcmp.lt.s32.totalorder %v218_v3, 16  ;;  %s651_s30 = sshra.s32 %s362_s29, 4  ;;  %s657_s11 = scalar_lea.hbm %s901_s3, 16  ;;  %s652_s30 = int_to_ptr.hbm [resolvable:$true] %s651_s30 }
  0x34   : > { %s653_s5 = scalar_lea.hbm %s652_s30, 8  ;;  %p658_p9 = scmp.lt.s32.totalorder %s652_s30, %s901_s3 }
  0x35   : > { %p654_p1 = scmp.ne.s32.totalorder %s652_s30, %s653_s5  ;;  %p659_p2 = scmp.lt.s32.totalorder %s657_s11, %s653_s5 }
  0x37   : > { %p655_p4 = pnand %p654_p1, %p799_p3  ;;  %p660_p10 = por %p659_p2, %p658_p9 }
  0x38   : > { %222 = vrot.lane.b32.xlu0 %v843_v0, %s712_s22 }
  0x39   : > { %p656_p8 = pneg %p655_p4 }
  0x3b   : > { %p661_p11 = pnand %p660_p10, %p656_p8 }
  0xa2   : > { %v231_v2 = vpop.permute.xlu0 %230 }
  0xa3   : > { %463 = vmatpush.msk.msra.mxu0 %vm233_vm0, %v231_v2 }
  0xa5   : > { %254 = vmatpush.msra.mxu0 %v843_v0 }
  0xaa   : > { %v223_v4 = vpop.permute.xlu0 %222 }
  0xab   : > { %v226_v6 = vsel %vm225_vm1, 0.0, %v223_v4 }
  0xac   : > { %464 = vmatpush.msk.msra.mxu0 %vm219_vm2, %v226_v6 }
  0xad   : > { %465 = vmatmul.msk.f32.vlgmr.msra.gmra.mxu0 %vm236_vm3, %v235_v5 }
 0x12a   : > { %v257_v7 = vpop.f32.mrf.mxu0 }
 0x12b   : > { %260 = vadd.xlane.f32.xlu1 %v257_v7  ;;  %v262_v8 = vmul.f32 %v257_v7, %v257_v7 }
 0x133   : > { %263 = vadd.xlane.f32.xlu1 %v262_v8 }
 0x19e   : > { %v261_v9 = vpop.xlane.xlu1 %260 }
 0x19f   : > { %v265_v10 = vmul.f32 0.0625, %v261_v9 }
 0x1a1   : > { %v267_v12 = vmul.f32 %v265_v10, %v265_v10  ;;  %v270_v23 = vsub.f32 %v257_v7, %v265_v10 }
 0x1a6   : > { %v264_v11 = vpop.xlane.xlu1 %263 }
 0x1a7   : > { %v266_v13 = vmul.f32 0.0625, %v264_v11 }
 0x1a9   : > { %v268_v14 = vsub.f32 %v266_v13, %v267_v12 }
 0x1ab   : > { %v269_v15 = vmax.f32 %v268_v14, 0.0 }
 0x1ad   : > { %v271_v16 = vadd.f32 1e-05, %v269_v15 }
 0x1af   : > { %543 = vrsqrt.f32 %v271_v16  ;;  %vm278_vm5 = vweird.f32 %v271_v16 }
 0x1b5   : > { %v544_v17 = vpop.eup %543 }
 0x1b6   : > { %v273_v18 = vmul.f32 %v544_v17, %v271_v16  ;;  %vm279_vm4 = vweird.f32 %v544_v17 }
 0x1b7   : > { %vm280_vm6 = vmor %vm278_vm5, %vm279_vm4 }
 0x1b8   : > { %v274_v19 = vmul.f32 %v544_v17, %v273_v18 }
 0x1ba   : > { %v275_v20 = vmul.f32 0.5, %v274_v19 }
 0x1bc   : > { %v276_v21 = vsub.f32 1.5, %v275_v20 }
 0x1be   : > { %v277_v22 = vmul.f32 %v544_v17, %v276_v21 }
 0x1c0   : > { %v281_v24 = vsel %vm280_vm6, %v544_v17, %v277_v22 }
 0x1c1   : > { %v282_v25 = vmul.f32 %v281_v24, %v270_v23 }
 0x1c3   : > { %vm283_vm7 = vcmp.gt.f32.partialorder %v282_v25, 0.0  ;;  %v284_v26 = vmul.f32 0.2, %v282_v25 }
 0x1c5   : > { %v285_v27 = vsel %vm283_vm7, %v282_v25, %v284_v26 }
 0x1c6   : > { %v286_v28 = vsel %vm219_vm2, %v285_v27, 0.0 }
 0x1c7   : > { %293 = vrot.lane.b32.xlu2 %v286_v28, %s711_s23 }
 0x1cf   : > { %288 = vrot.lane.b32.xlu2 %v286_v28, %s712_s22 }
 0x221   : > { %v294_v29 = vpop.permute.xlu2 %293 }
 0x222   : > { %466 = vmatpush.msk.msra.mxu1 %vm233_vm0, %v294_v29 }
 0x224   : > { %467 = vmatpush.msk.msra.mxu1 %vm219_vm2, %v285_v27 }
 0x229   : > { %v289_v30 = vpop.permute.xlu2 %288 }
 0x22a   : > { %v291_v32 = vsel %vm225_vm1, 0.0, %v289_v30 }
 0x22b   : > { %468 = vmatpush.msk.msra.mxu1 %vm219_vm2, %v291_v32 }
 0x22c   : > { %469 = vmatmul.msk.f32.vlgmr.msra.gmra.mxu1 %vm236_vm3, %v297_v31 }
 0x2a9   : > { %v318_v33 = vpop.f32.mrf.mxu1 }
 0x2aa   : > { %321 = vadd.xlane.f32.xlu0 %v318_v33  ;;  %v323_v34 = vmul.f32 %v318_v33, %v318_v33 }
 0x2ac   : > { %324 = vadd.xlane.f32.xlu1 %v323_v34 }
 0x31d   : > { %v322_v35 = vpop.xlane.xlu0 %321 }
 0x31e   : > { %v326_v36 = vmul.f32 0.0625, %v322_v35 }
 0x31f   : > { %v325_v37 = vpop.xlane.xlu1 %324 }
 0x320   : > { %v328_v38 = vmul.f32 %v326_v36, %v326_v36  ;;  %v327_v39 = vmul.f32 0.0625, %v325_v37  ;;  %v331_v49 = vsub.f32 %v318_v33, %v326_v36 }
 0x322   : > { %v329_v40 = vsub.f32 %v327_v39, %v328_v38 }
 0x324   : > { %v330_v41 = vmax.f32 %v329_v40, 0.0 }
 0x326   : > { %v332_v42 = vadd.f32 1e-05, %v330_v41 }
 0x328   : > { %545 = vrsqrt.f32 %v332_v42  ;;  %vm339_vm9 = vweird.f32 %v332_v42 }
 0x32e   : > { %v546_v43 = vpop.eup %545 }
 0x32f   : > { %v334_v44 = vmul.f32 %v546_v43, %v332_v42  ;;  %vm340_vm8 = vweird.f32 %v546_v43 }
 0x330   : > { %vm341_vm10 = vmor %vm339_vm9, %vm340_vm8 }
 0x331   : > { %v335_v45 = vmul.f32 %v546_v43, %v334_v44 }
 0x333   : > { %v336_v46 = vmul.f32 0.5, %v335_v45 }
 0x335   : > { %v337_v47 = vsub.f32 1.5, %v336_v46 }
 0x337   : > { %v338_v48 = vmul.f32 %v546_v43, %v337_v47 }
 0x339   : > { %v342_v50 = vsel %vm341_vm10, %v546_v43, %v338_v48 }
 0x33a   : > { %v343_v51 = vmul.f32 %v342_v50, %v331_v49 }
 0x33c   : > { %v344_v52 = vadd.f32 %v343_v51, %v843_v0 }
 0x33e   : > { %345 = vst [vmem:[%s216_s27] sm:$0xff] %v344_v52 }
 0x33f   : > { %664 = shalt.err (!%p661_p11)
}
 0x340   : > { %484 = dma.vmem_to_hbm [thread:$0]  (%p799_p3), %s360_s28, 128, %s362_s29, %s347_s16  }
 0x341 PF: > { %s373_s9 = sand.u32 1, %s695_s12   ;;  %p907_p12 = scmp.ge.s32.totalorder %s707_s15, 2 }
 0x342   : > { %s374_s21 = scalar_lea.sflag [#allocation4], %s373_s9 }
 0x343   : > { %p498_p13 = pnand %p907_p12, %p768_p6 }
 0x345   : > { %p499_p0 = pneg %p498_p13 }
 0x347   : > { %690 = dma.done.wait (%p499_p0), %s374_s21, 128  }
 0x348   : > { %692 = vsyncadd (%p499_p0), %s374_s21, 4294967168  ;;  %p17_p5 = scmp.ge.s32.totalorder %s789_s4, 4   ;;  %s908_s12 = smov %s699_s13 }
 0x349   : > { %s909_s13 = smov %s703_s14  ;;  %s910_s14 = smov %s805_s8 }
 0x34a   : > { %s911_s15 = smov %s789_s4  ;;  %19 = sbr.rel (!%p17_p5) target bundleno = 6 (0x6), region = 85 }
 0x34f   :  { %380 = vsyncpa [#allocation3], 1 }
 0x350   :  { %382 = vsyncpa [#allocation3 + $0x1], 1 }
 0x351   :  { %383 = vsyncpa [#allocation6], 1 }
 0x352   :  { %384 = vsyncpa [#allocation4], 1 }
 0x353   :  { %386 = vsyncpa [#allocation4 + $0x1], 1 }

</bundles_post_ra>
